<compile_context>
chip_gen: v6e
topology: v6e:2x2x1
jax: 0.10.0
libtpu: 0.0.40
codegen_flags: <defaults>
</compile_context>

<pallas_src>
import functools

import jax
import jax.numpy as jnp
from jax.experimental import pallas as pl
from jax.experimental.pallas import tpu as pltpu


def _round_up(n: int, m: int) -> int:
    return ((n + m - 1) // m) * m


def _vmem_capacity_bytes() -> int:
    """Per-core VMEM capacity; conservative 64 MiB (v7x) fallback."""
    try:
        cap = int(pltpu.get_tpu_info().vmem_capacity_bytes)
        if cap > 0:
            return cap
    except Exception:
        pass
    return 64 << 20


def _bf16_activations_ok() -> bool:
    """bf16 VPU/EUP exist on v6e/v7x; keep f32 activations on v5e and older."""
    try:
        kind = jax.devices()[0].device_kind.lower()
    except Exception:
        return False
    return not any(v in kind for v in ("v2", "v3", "v4", "v5"))


def adaptive_net_kernel(x_ref, w1_ref, b1_ref, w2_ref, b2_ref, w3_ref, b3_ref,
                        out_ref, *, act_dtype):
    # fc1: bf16 MXU matmul, f32 accumulation, sigmoid in act_dtype.
    h1 = jnp.dot(x_ref[...], w1_ref[...], preferred_element_type=jnp.float32)
    h1 = jax.nn.sigmoid((h1 + b1_ref[...]).astype(act_dtype))        # [TB, H1]

    tb = h1.shape[0]
    h2_dim = b2_ref.shape[1]
    if w2_ref.shape[0] == 1:
        # Grouped fc2 on the VPU/XLU: per-chunk dot product against the
        # flattened [1, H1] weight; avoids the mostly-zero dense [H1, H2].
        g = w2_ref.shape[1] // h2_dim
        weighted = h1.astype(jnp.float32) * w2_ref[...]               # [TB, H1]
        h2 = weighted.reshape(tb, h2_dim, g).sum(axis=-1)             # [TB, H2]
    else:
        # Block-diagonal fc2 on the MXU (best for small H2).
        h2 = jnp.dot(h1.astype(jnp.bfloat16), w2_ref[...],
                     preferred_element_type=jnp.float32)
    h2 = jax.nn.sigmoid((h2 + b2_ref[...]).astype(act_dtype))         # [TB, H2]

    # fc3 (no activation); lane-padded bf16 output (wrapper slices/casts back).
    out = jnp.dot(h2.astype(jnp.bfloat16), w3_ref[...],
                  preferred_element_type=jnp.float32)
    out_ref[...] = (out + b3_ref[...]).astype(out_ref.dtype)          # [TB, Fp]


def _vmem_limit_bytes(tb, f_in, h1, h2, f_out_pad, w2_bytes):
    f32, bf16 = 4, 2
    # streamed tensors (bf16), double-buffered
    stream = 2 * tb * f_in * bf16 + 2 * tb * f_out_pad * bf16
    # resident weights / biases (single-buffered via pl.Buffered(1))
    weights = (f_in * h1 + h2 * f_out_pad) * bf16 + w2_bytes
    biases = (h1 + h2 + f_out_pad) * f32
    # in-kernel intermediates (h1/h2/out + casts), with 2x slack
    inter = 2 * tb * (h1 + h2 + f_out_pad) * f32 + tb * (f_in + h1 + h2) * bf16
    est = stream + weights + biases + inter + (4 << 20)
    cap = _vmem_capacity_bytes()
    return int(min(max(est, 16 << 20), (cap * 3) // 4))


def adaptive_net_forward(x, kparams, output_features, *, block_batch=512):
    """x: [B, input_features] float32. kparams: output of prepare_kernel_params."""
    w1, b1 = kparams["w1"], kparams["b1"]        # [F_in, H1] bf16, [1, H1] f32
    w2, b2 = kparams["w2"], kparams["b2"]        # dense [H1,H2] bf16 or flat [1,H1] f32
    w3, b3 = kparams["w3"], kparams["b3"]        # [H2, Fp] bf16, [1, Fp] f32

    B, F_in = x.shape
    H1 = w1.shape[1]
    H2 = b2.shape[1]
    F_out_pad = w3.shape[1]

    # Stream x as bf16 (it is a bf16 matmul operand anyway).
    x = x.astype(jnp.bfloat16)

    # Batch tile: always a multiple of 8 sublanes, up to block_batch rows.
    TB = max(8, _round_up(min(block_batch, B), 8))
    B_pad = _round_up(B, TB)
    # Keep >= 2 grid steps when the batch allows it so the "parallel" axis can
    # shard across both TensorCores on v7x (harmless on single-TC chips).
    if B_pad // TB < 2 and B > 8:
        TB = max(8, _round_up(pl.cdiv(B, 2), 8))
        B_pad = _round_up(B, TB)
    if B_pad != B:
        x = jnp.pad(x, ((0, B_pad - B), (0, 0)))

    grid = (B_pad // TB,)
    const = lambda i: (0, 0)                      # weights stay VMEM-resident
    resident = dict(pipeline_mode=pl.Buffered(1))  # single buffer for constants

    act_dtype = jnp.bfloat16 if _bf16_activations_ok() else jnp.float32
    w2_bytes = int(w2.size) * w2.dtype.itemsize

    out = pl.pallas_call(
        functools.partial(adaptive_net_kernel, act_dtype=act_dtype),
        out_shape=jax.ShapeDtypeStruct((B_pad, F_out_pad), jnp.bfloat16),
        grid=grid,
        in_specs=[
            pl.BlockSpec((TB, F_in), lambda i: (i, 0)),          # x (streamed bf16)
            pl.BlockSpec(w1.shape, const, **resident),           # w1
            pl.BlockSpec(b1.shape, const, **resident),           # b1
            pl.BlockSpec(w2.shape, const, **resident),           # w2 (dense or flat)
            pl.BlockSpec(b2.shape, const, **resident),           # b2
            pl.BlockSpec(w3.shape, const, **resident),           # w3 (lane-padded)
            pl.BlockSpec(b3.shape, const, **resident),           # b3 (lane-padded)
        ],
        out_specs=pl.BlockSpec((TB, F_out_pad), lambda i: (i, 0)),
        compiler_params=pltpu.CompilerParams(
            dimension_semantics=("parallel",),
            vmem_limit_bytes=_vmem_limit_bytes(TB, F_in, H1, H2, F_out_pad,
                                               w2_bytes)),
    )(x, w1, b1, w2, b2, w3, b3)

    return out[:B, :output_features].astype(jnp.float32)


def prepare_kernel_params(params, lane=128, fc2_mode="auto"):
    """One-time transform of logical params into kernel-ready buffers."""
    w2g = params["w2_group"]                                  # [H2, G]
    H2, G = w2g.shape
    H1 = H2 * G

    if fc2_mode == "auto":
        # Dense block-diag MXU path while the [H1, H2] bf16 weight is small;
        # grouped VPU contraction once it gets big (saves VMEM + wasted MACs).
        fc2_mode = "grouped" if (H1 * H2 * 2 > (4 << 20)) else "dense"
    if fc2_mode == "dense":
        eye = jnp.eye(H2, dtype=w2g.dtype)                    # [H2, H2]
        w2 = (w2g[:, :, None] * eye[:, None, :]).reshape(H1, H2)
        w2 = w2.astype(jnp.bfloat16)                          # [H1, H2]
    else:
        w2 = w2g.reshape(1, H1).astype(jnp.float32)           # [1, H1] flat

    w3, b3 = params["w3"], params["b3"]                       # [H2, F_out], [1, F_out]
    F_out = w3.shape[1]
    pad = _round_up(F_out, lane) - F_out
    w3p = jnp.pad(w3, ((0, 0), (0, pad)))
    b3p = jnp.pad(b3, ((0, 0), (0, pad)))

    return {
        "w1": params["w1"].astype(jnp.bfloat16),
        "b1": params["b1"],
        "w2": w2,
        "b2": params["b2"],
        "w3": w3p.astype(jnp.bfloat16),
        "b3": b3p,
    }


def init_params(key, input_features, hidden_features1, hidden_features2,
                output_features):
    """Deterministic init mimicking torch.nn.Linear default (uniform +/- 1/sqrt(fan_in))."""
    assert hidden_features1 % hidden_features2 == 0
    group_size = hidden_features1 // hidden_features2
    ks = jax.random.split(key, 6)

    def uni(k, shape, fan_in):
        bound = 1.0 / jnp.sqrt(fan_in)
        return jax.random.uniform(k, shape, jnp.float32, -bound, bound)

    return {
        # fc1: torch weight [H1, F_in] -> stored transposed [F_in, H1]
        "w1": uni(ks[0], (input_features, hidden_features1), input_features),
        "b1": uni(ks[1], (1, hidden_features1), input_features),
        # fc2_list: H2 layers of Linear(group_size, 1); stacked -> [H2, G]
        "w2_group": uni(ks[2], (hidden_features2, group_size), group_size),
        "b2": uni(ks[3], (1, hidden_features2), group_size),
        # fc3: torch weight [F_out, H2] -> stored transposed [H2, F_out]
        "w3": uni(ks[4], (hidden_features2, output_features), hidden_features2),
        "b3": uni(ks[5], (1, output_features), hidden_features2),
    }


def reference_forward(x, params):
    """Plain-JAX f32 reference reproducing the PyTorch forward exactly."""
    h1 = jax.nn.sigmoid(x @ params["w1"] + params["b1"])             # [B, H1]
    H2, G = params["w2_group"].shape
    B = x.shape[0]
    chunks = h1.reshape(B, H2, G)                                    # chunk along dim=1
    h2 = jax.nn.sigmoid(
        jnp.einsum("bhg,hg->bh", chunks, params["w2_group"]) + params["b2"])
    return h2 @ params["w3"] + params["b3"]


if __name__ == "__main__":
    batch = 4
    input_features = 16
    hidden_features1 = 32
    hidden_features2 = 8
    output_features = 4

    key = jax.random.PRNGKey(0)
    k_x, k_p = jax.random.split(key)
    x = jax.random.normal(k_x, (batch, input_features), dtype=jnp.float32)
    params = init_params(k_p, input_features, hidden_features1,
                         hidden_features2, output_features)
    kparams = prepare_kernel_params(params)   # one-time: fc2 layout, pads, bf16

    out = adaptive_net_forward(x, kparams, output_features)
    out = jax.block_until_ready(out)

    ref = reference_forward(x, params)
    assert out.shape == (batch, output_features)
    max_err = jnp.max(jnp.abs(out - ref))
    # bf16 MXU operands / bf16 output vs f32 reference -> loosened tolerance.
    assert jnp.allclose(out, ref, atol=3e-2, rtol=3e-2), (
        f"mismatch: max abs err {max_err}")

    print("KERNEL_OK")
</pallas_src>

<mosaic_0001>
module attributes {stable_mosaic.version = 11 : i64} {
  func.func @adaptive_net_kernel(%arg0: i32, %arg1: memref<8x16xbf16, #tpu.memory_space<vmem>>, %arg2: memref<16x32xbf16, #tpu.memory_space<vmem>>, %arg3: memref<1x32xf32, #tpu.memory_space<vmem>>, %arg4: memref<32x8xbf16, #tpu.memory_space<vmem>>, %arg5: memref<1x8xf32, #tpu.memory_space<vmem>>, %arg6: memref<8x128xbf16, #tpu.memory_space<vmem>>, %arg7: memref<1x128xf32, #tpu.memory_space<vmem>>, %arg8: memref<8x128xbf16, #tpu.memory_space<vmem>>) attributes {dimension_semantics = [#tpu.dimension_semantics<parallel>], iteration_bounds = array<i64: 1>, scalar_prefetch = 0 : i64, scratch_operands = 0 : i64, tpu.core_type = #tpu.core_type<tc>, window_params = [{transform_indices = @transform_0, window_bounds = array<i64: 8, 16>}, {pipeline_mode = #tpu.pipeline_mode<synchronous>, transform_indices = @transform_1, window_bounds = array<i64: 16, 32>}, {pipeline_mode = #tpu.pipeline_mode<synchronous>, transform_indices = @transform_2, window_bounds = array<i64: 1, 32>}, {pipeline_mode = #tpu.pipeline_mode<synchronous>, transform_indices = @transform_3, window_bounds = array<i64: 32, 8>}, {pipeline_mode = #tpu.pipeline_mode<synchronous>, transform_indices = @transform_4, window_bounds = array<i64: 1, 8>}, {pipeline_mode = #tpu.pipeline_mode<synchronous>, transform_indices = @transform_5, window_bounds = array<i64: 8, 128>}, {pipeline_mode = #tpu.pipeline_mode<synchronous>, transform_indices = @transform_6, window_bounds = array<i64: 1, 128>}, {transform_indices = @transform_7, window_bounds = array<i64: 8, 128>}]} {
    %c0 = arith.constant 0 : index
    %c0_0 = arith.constant 0 : index
    %0 = vector.load %arg1[%c0, %c0_0] : memref<8x16xbf16, #tpu.memory_space<vmem>>, vector<8x16xbf16>
    %c0_1 = arith.constant 0 : index
    %c0_2 = arith.constant 0 : index
    %1 = vector.load %arg2[%c0_1, %c0_2] : memref<16x32xbf16, #tpu.memory_space<vmem>>, vector<16x32xbf16>
    %cst = arith.constant dense<0.000000e+00> : vector<8x32xf32>
    %2 = tpu.matmul %0, %1, %cst {dimension_numbers = #tpu.dot_dimension_numbers<[1], [0], [0], [1], [0, 0, 1, 1], [], []>} : vector<8x16xbf16>, vector<16x32xbf16>, vector<8x32xf32> -> vector<8x32xf32>
    %c0_3 = arith.constant 0 : index
    %c0_4 = arith.constant 0 : index
    %3 = vector.load %arg3[%c0_3, %c0_4] : memref<1x32xf32, #tpu.memory_space<vmem>>, vector<1x32xf32>
    %4 = vector.broadcast %3 : vector<1x32xf32> to vector<8x32xf32>
    %5 = arith.addf %2, %4 : vector<8x32xf32>
    %6 = arith.truncf %5 : vector<8x32xf32> to vector<8x32xbf16>
    %7 = arith.negf %6 : vector<8x32xbf16>
    %8 = math.exp %7 : vector<8x32xbf16>
    %cst_5 = arith.constant 1.000000e+00 : bf16
    %9 = vector.broadcast %cst_5 : bf16 to vector<8x32xbf16>
    %10 = arith.addf %9, %8 : vector<8x32xbf16>
    %11 = arith.divf %9, %10 : vector<8x32xbf16>
    %c0_6 = arith.constant 0 : index
    %c0_7 = arith.constant 0 : index
    %12 = vector.load %arg4[%c0_6, %c0_7] : memref<32x8xbf16, #tpu.memory_space<vmem>>, vector<32x8xbf16>
    %cst_8 = arith.constant dense<0.000000e+00> : vector<8x8xf32>
    %13 = tpu.matmul %11, %12, %cst_8 {dimension_numbers = #tpu.dot_dimension_numbers<[1], [0], [0], [1], [0, 0, 1, 1], [], []>} : vector<8x32xbf16>, vector<32x8xbf16>, vector<8x8xf32> -> vector<8x8xf32>
    %c0_9 = arith.constant 0 : index
    %c0_10 = arith.constant 0 : index
    %14 = vector.load %arg5[%c0_9, %c0_10] : memref<1x8xf32, #tpu.memory_space<vmem>>, vector<1x8xf32>
    %15 = vector.broadcast %14 : vector<1x8xf32> to vector<8x8xf32>
    %16 = arith.addf %13, %15 : vector<8x8xf32>
    %17 = arith.truncf %16 : vector<8x8xf32> to vector<8x8xbf16>
    %18 = arith.negf %17 : vector<8x8xbf16>
    %19 = math.exp %18 : vector<8x8xbf16>
    %cst_11 = arith.constant 1.000000e+00 : bf16
    %20 = vector.broadcast %cst_11 : bf16 to vector<8x8xbf16>
    %21 = arith.addf %20, %19 : vector<8x8xbf16>
    %22 = arith.divf %20, %21 : vector<8x8xbf16>
    %c0_12 = arith.constant 0 : index
    %c0_13 = arith.constant 0 : index
    %23 = vector.load %arg6[%c0_12, %c0_13] : memref<8x128xbf16, #tpu.memory_space<vmem>>, vector<8x128xbf16>
    %cst_14 = arith.constant dense<0.000000e+00> : vector<8x128xf32>
    %24 = tpu.matmul %22, %23, %cst_14 {dimension_numbers = #tpu.dot_dimension_numbers<[1], [0], [0], [1], [0, 0, 1, 1], [], []>} : vector<8x8xbf16>, vector<8x128xbf16>, vector<8x128xf32> -> vector<8x128xf32>
    %c0_15 = arith.constant 0 : index
    %c0_16 = arith.constant 0 : index
    %25 = vector.load %arg7[%c0_15, %c0_16] : memref<1x128xf32, #tpu.memory_space<vmem>>, vector<1x128xf32>
    %26 = vector.broadcast %25 : vector<1x128xf32> to vector<8x128xf32>
    %27 = arith.addf %24, %26 : vector<8x128xf32>
    %28 = arith.truncf %27 : vector<8x128xf32> to vector<8x128xbf16>
    %c0_17 = arith.constant 0 : index
    %c0_18 = arith.constant 0 : index
    %29 = vector.load %arg8[%c0_17, %c0_18] : memref<8x128xbf16, #tpu.memory_space<vmem>>, vector<8x128xbf16>
    tpu.vector_store %arg8[%c0_17, %c0_18], %28 {strides = array<i32>} : memref<8x128xbf16, #tpu.memory_space<vmem>>, vector<8x128xbf16>,
    return
  }
  func.func @transform_0(%arg0: i32) -> (i32, i32) {
    %c0_i32 = arith.constant 0 : i32
    %c0_i32_0 = arith.constant 0 : i32
    return %arg0, %c0_i32 : i32, i32
  }
  func.func @transform_1(%arg0: i32) -> (i32, i32) {
    %c0_i32 = arith.constant 0 : i32
    %c0_i32_0 = arith.constant 0 : i32
    %c0_i32_1 = arith.constant 0 : i32
    return %c0_i32, %c0_i32_0 : i32, i32
  }
  func.func @transform_2(%arg0: i32) -> (i32, i32) {
    %c0_i32 = arith.constant 0 : i32
    %c0_i32_0 = arith.constant 0 : i32
    %c0_i32_1 = arith.constant 0 : i32
    return %c0_i32, %c0_i32_0 : i32, i32
  }
  func.func @transform_3(%arg0: i32) -> (i32, i32) {
    %c0_i32 = arith.constant 0 : i32
    %c0_i32_0 = arith.constant 0 : i32
    %c0_i32_1 = arith.constant 0 : i32
    return %c0_i32, %c0_i32_0 : i32, i32
  }
  func.func @transform_4(%arg0: i32) -> (i32, i32) {
    %c0_i32 = arith.constant 0 : i32
    %c0_i32_0 = arith.constant 0 : i32
    %c0_i32_1 = arith.constant 0 : i32
    return %c0_i32, %c0_i32_0 : i32, i32
  }
  func.func @transform_5(%arg0: i32) -> (i32, i32) {
    %c0_i32 = arith.constant 0 : i32
    %c0_i32_0 = arith.constant 0 : i32
    %c0_i32_1 = arith.constant 0 : i32
    return %c0_i32, %c0_i32_0 : i32, i32
  }
  func.func @transform_6(%arg0: i32) -> (i32, i32) {
    %c0_i32 = arith.constant 0 : i32
    %c0_i32_0 = arith.constant 0 : i32
    %c0_i32_1 = arith.constant 0 : i32
    return %c0_i32, %c0_i32_0 : i32, i32
  }
  func.func @transform_7(%arg0: i32) -> (i32, i32) {
    %c0_i32 = arith.constant 0 : i32
    %c0_i32_0 = arith.constant 0 : i32
    return %arg0, %c0_i32 : i32, i32
  }
}

</mosaic_0001>

<bundles_post_ra>
// kernel: tpu_custom_call.1
= control target key start
LH: loop header
LB: loop body
LE: loop exit
PB: predicated region body
PF: predicated region fallthrough
CT: control target
= control target key end

     0   :  { %v318_v1 = vmov 0.0   ;;  %vm45_vm0 = vcmask 130048   ;;  %vm319_vm1 = vmmov 0   ;;  %s388_s0 = inlined_call_operand.vmem [shape: bf16[8,16], index: 0, kind: input, shape index: {}]   ;;  %s389_s1 = inlined_call_operand.vmem [shape: bf16[16,32], index: 1, kind: input, shape index: {}]   ;;  %s390_s2 = inlined_call_operand.vmem [shape: f32[1,32], index: 2, kind: input, shape index: {}]   ;;  %s391_s3 = inlined_call_operand.vmem [shape: bf16[32,8], index: 3, kind: input, shape index: {}]   ;;  %s392_s4 = inlined_call_operand.vmem [shape: f32[1,8], index: 4, kind: input, shape index: {}]   ;;  %s393_s5 = inlined_call_operand.vmem [shape: bf16[8,128], index: 5, kind: input, shape index: {}]   ;;  %s394_s6 = inlined_call_operand.vmem [shape: f32[1,128], index: 6, kind: input, shape index: {}]   ;;  %s395_s7 = inlined_call_operand.hbm [shape: bf16[8,128], index: 7, kind: output, shape index: {}]  }
   0x1   :  { %v285_v0 = vld [vmem:[%s389_s1] sm:$0xff]   ;;  %262 = vmatprep.subr.bf16.mxu0 %v318_v1  ;;  %268 = vmatprep.subr.bf16.mxu1 %v318_v1 }
   0x2   :  { %v29_v2 = vld [vmem:[%s388_s0] sm:$0xf]  ;;  %263 = vmatpush3.bf16.msra.mxu0 %v285_v0  ;;  %264 = vmatprep.mubr.msk.bf16.mxu0 %vm319_vm1, %v318_v1 }
   0x3   :  { %272 = vmatprep.mubr.msk.bf16.mxu1 %vm319_vm1, %v318_v1  ;;  %276 = vmatprep.subr.bf16.mxu0 %v318_v1 }
   0x4   :  { %12 = vsyncpa [#allocation3], 0  ;;  %v286_v3 = vld [vmem:[%s391_s3 + $0x8] sm:$0xff]   ;;  %v287_v4 = vld [vmem:[%s391_s3] sm:$0xff]   ;;  %vm120_vm2 = vcmask 261120   ;;  %vm184_vm3 = vcmask 1043456  }
   0x5   :  { %265 = vmatmul.mubr.msk.bf16.vlgmr.msra.gmra.mxu0 %vm45_vm0, %v29_v2  ;;  %269 = vmatpush3.bf16.msra.mxu1 %v286_v3  ;;  %v244_v5 = vld [vmem:[%s390_s2] ss:$0 sm:$0xff]  ;;  %vm180_vm4 = vcmask 64512  }
   0x6   :  { %278 = vmatprep.mubr.msk.bf16.mxu0 %vm319_vm1, %v318_v1  ;;  %270 = vmatprep.subr.bf16.mxu1 %v318_v1  ;;  %v172_v17 = vld [vmem:[%s393_s5] sm:$0xf] }
   0x7   :  { %v186_v18 = vsel %vm184_vm3, %v172_v17, 0  ;;  %v248_v19 = vld [vmem:[%s392_s4] ss:$0 sm:$0xff]  ;;  %s320_s4 = smov [#allocation2]  }
   0x8   :  { %277 = vmatpush3.bf16.msra.mxu0 %v186_v18  ;;  %v253_v31 = vld [vmem:[%s394_s6] ss:$0 sm:$0xff]  ;;  %s236_s12 = sshll.u32 %s320_s4, 4  ;;  %s237_s12 = int_to_ptr.vmem [resolvable:$true] %s236_s12 }
   0x9   :  { %271 = vmatpush3.bf16.msra.mxu1 %v287_v4  ;;  %s296_s13 = scalar_lea.vmem %s237_s12, 64  ;;  %p301_p1 = scmp.lt.s32.totalorder %s237_s12, %s237_s12 }
   0xa   :  { %p297_p0 = scmp.ne.s32.totalorder %s237_s12, %s296_s13  ;;  %p302_p2 = scmp.lt.s32.totalorder %s296_s13, %s296_s13 }
   0xc   :  { %p303_p3 = por %p302_p2, %p301_p1 }
   0xe   :  { %p304_p4 = pnand %p303_p3, %p297_p0 }
  0xc5   :  { %v83_v6 = vpop.f32.mrf.mxu0 }
  0xc6   :  { %v84_v7 = vadd.f32 %v244_v5, %v83_v6 }
  0xc7   :  { %v266_v8 = vpop.f32.mrf.mxu0 }
  0xc8   :  { %v89_v9 = vpack.c.bf16 %v84_v7, %v84_v7 }
  0xc9   :  { %v86_v10 = vpop.f32.mrf.mxu0 }
  0xca   :  { %v247_v11 = vmul.bf16 3216621497, %v89_v9 }
  0xcb   :  { %v267_v12 = vpop.f32.mrf.mxu0 }
  0xcc   :  { %288 = vpow.bf16 %v247_v11 }
  0xda   :  { %v289_v13 = vpop.eup %288 }
  0xdb   :  { %v94_v14 = vadd.bf16 1065369472, %v289_v13 }
  0xdd   :  { %290 = vrcp.bf16 %v94_v14 }
  0xeb   :  { %v291_v15 = vpop.eup %290 }
  0xec   :  { %v96_v16 = vmul.bf16 1065369472, %v291_v15 }
  0xee   :  { %273 = vmatmul.mubr.msk.bf16.vlgmr.msra.gmra.mxu1 %vm120_vm2, %v96_v16 }
 0x1ae   :  { %v158_v20 = vpop.f32.mrf.mxu1 }
 0x1af   :  { %v159_v21 = vadd.f32 %v248_v19, %v158_v20 }
 0x1b0   :  { %v274_v22 = vpop.f32.mrf.mxu1 }
 0x1b1   :  { %v164_v23 = vpack.c.bf16 %v159_v21, %v159_v21 }
 0x1b2   :  { %v161_v24 = vpop.f32.mrf.mxu1 }
 0x1b3   :  { %v252_v25 = vmul.bf16 3216621497, %v164_v23 }
 0x1b4   :  { %v275_v26 = vpop.f32.mrf.mxu1 }
 0x1b5   :  { %292 = vpow.bf16 %v252_v25 }
 0x1c3   :  { %v293_v27 = vpop.eup %292 }
 0x1c4   :  { %v169_v28 = vadd.bf16 1065369472, %v293_v27 }
 0x1c6   :  { %294 = vrcp.bf16 %v169_v28 }
 0x1d4   :  { %v295_v29 = vpop.eup %294 }
 0x1d5   :  { %v171_v30 = vmul.bf16 1065369472, %v295_v29 }
 0x1d7   :  { %279 = vmatmul.mubr.msk.bf16.vlgmr.msra.gmra.mxu0 %vm180_vm4, %v171_v30 }
 0x297   :  { %v222_v32 = vpop.f32.mrf.mxu0 }
 0x298   :  { %v223_v33 = vadd.f32 %v253_v31, %v222_v32 }
 0x299   :  { %v280_v34 = vpop.f32.mrf.mxu0 }
 0x29a   :  { %v228_v35 = vpack.c.bf16 %v223_v33, %v223_v33 }
 0x29b   :  { %v225_v36 = vpop.f32.mrf.mxu0 }
 0x29c   :  { %229 = vst [vmem:[#allocation2] sm:$0xf] %v228_v35 }
 0x29d   :  { %v281_v37 = vpop.f32.mrf.mxu0 }
 0x29e   :  { %307 = shalt.err (!%p304_p4)
}
 0x29f   :  { %239 = dma.vmem_to_hbm [thread:$0]  %s237_s12, 64, %s395_s7, [#allocation3]  }
 0x2a0   :  { %316 = dma.done.wait [#allocation3], 64  }
 0x2a1   :  { %317 = vsyncadd [#allocation3], 4294967232 }
 0x2a2   :  { %243 = vsyncpa [#allocation3], 1 }

</bundles_post_ra>
